<compile_context>
chip_gen: v6e
topology: v6e:2x2x1
jax: 0.10.0
libtpu: 0.0.40
codegen_flags: <defaults>
</compile_context>

<pallas_src>
import functools

import jax
import jax.numpy as jnp
from jax import lax
from jax.experimental import pallas as pl
from jax.experimental.pallas import tpu as pltpu


_TARGET_BLOCK_BYTES = 4 * 1024 * 1024   # per input block, PADDED accounting


# ---------------------------------------------------------------------------
# Tile selection (padded-layout accounting)
# ---------------------------------------------------------------------------

def _pad_up(v, m):
    return -(-v // m) * m


def _sublane_multiple(itemsize):
    return {4: 8, 2: 16, 1: 32}.get(itemsize, 8)


def _padded_block_bytes(bt, tn, c, itemsize):
    """True VMEM bytes of a (bt, tn, c) block after (sublane, 128) padding."""
    sub = _sublane_multiple(itemsize)
    return bt * _pad_up(max(tn, 1), sub) * _pad_up(c, 128) * itemsize


def _choose_tiles(B, Np, Cp, itemsize, tile_n=None):
    """Pick (batch tile, point tile) so the PADDED block stays in budget."""
    sub = _sublane_multiple(itemsize)
    if tile_n is not None:
        tn = int(tile_n)
        if tn < Np and tn % 8 != 0:
            raise ValueError("tile_n must be a multiple of 8 (or >= N)")
        tn = min(tn, Np)
    else:
        if _padded_block_bytes(1, Np, Cp, itemsize) <= _TARGET_BLOCK_BYTES:
            tn = Np                                     # whole sample per step
        else:
            rows = _TARGET_BLOCK_BYTES // (_pad_up(Cp, 128) * itemsize)
            tn = min(Np, max(sub, (rows // sub) * sub))
    # Largest divisor of B whose padded block fits, capped at ceil(B/2) so the
    # "parallel" batch axis keeps >= 2 steps (v7x has 2 TensorCores).
    bt_cap = max(1, -(-B // 2))
    bt = 1
    for d in range(bt_cap, 0, -1):
        if B % d == 0 and _padded_block_bytes(d, tn, Cp, itemsize) <= _TARGET_BLOCK_BYTES:
            bt = d
            break
    return bt, tn


# ---------------------------------------------------------------------------
# Kernels.  Block layout: x (BT, TN, C'); out (BT, 1, C') f32;
# scratch acc (BT, 8 or 1, C') f32.  Grid: (batch groups, N tiles),
# reduction (N) axis last and marked "arbitrary".
# ---------------------------------------------------------------------------

def _mask_rows(x, n_idx, tn, n_total, fill):
    """Replace rows whose global point index >= n_total with `fill`."""
    rows = lax.broadcasted_iota(jnp.int32, x.shape, 1)
    return jnp.where(rows + n_idx * tn < n_total, x, jnp.float32(fill))


def _transform(x, op, eps, static_int_p, p_val):
    x = x.astype(jnp.float32)
    if op == "gem":
        x = jnp.maximum(x, jnp.float32(eps))
        if static_int_p is not None:
            x = lax.integer_pow(x, static_int_p)     # VPU fast path (p=3 etc.)
        else:
            x = jnp.power(x, p_val)                  # EUP path for traced p
    return x


def _accumulate(x, acc_ref, is_max, fold):
    bt, tn, cp = x.shape
    if fold:
        # Fold TN rows onto 8 sublane partials: whole-vreg vadd/vmax only,
        # no per-tile cross-sublane XLU collapse.
        xr = x.reshape(bt, tn // 8, 8, cp)
        part = jnp.max(xr, axis=1) if is_max else jnp.sum(xr, axis=1)
    else:
        part = (jnp.max(x, axis=1, keepdims=True) if is_max
                else jnp.sum(x, axis=1, keepdims=True))
    if is_max:
        acc_ref[...] = jnp.maximum(acc_ref[...], part)
    else:
        acc_ref[...] = acc_ref[...] + part


def _kernel_body(x_ref, o_ref, acc_ref, p_val, *, op, n_total, tn, needs_mask,
                 fold, eps, static_int_p):
    n = pl.program_id(1)
    last = pl.num_programs(1) - 1
    is_max = (op == "max")
    neutral = -jnp.inf if is_max else 0.0

    @pl.when(n == 0)
    def _init():
        acc_ref[...] = jnp.full(acc_ref.shape, neutral, acc_ref.dtype)

    def _step(mask_tail):
        x = _transform(x_ref[...], op, eps, static_int_p, p_val)
        if mask_tail:
            x = _mask_rows(x, n, tn, n_total, neutral)
        _accumulate(x, acc_ref, is_max, fold)

    if needs_mask:
        # Only the ragged last tile pays the iota/compare/select cost.
        @pl.when(n != last)
        def _full_tiles():
            _step(False)

        @pl.when(n == last)
        def _tail_tile():
            _step(True)
    else:
        _step(False)

    @pl.when(n == last)
    def _finalize():
        a = acc_ref[...]
        red = (jnp.max(a, axis=1, keepdims=True) if is_max
               else jnp.sum(a, axis=1, keepdims=True))
        o_ref[...] = red.astype(o_ref.dtype)


def _pool_kernel(x_ref, o_ref, acc_ref, *, op, n_total, tn, needs_mask, fold,
                 eps, static_int_p):
    _kernel_body(x_ref, o_ref, acc_ref, None, op=op, n_total=n_total, tn=tn,
                 needs_mask=needs_mask, fold=fold, eps=eps,
                 static_int_p=static_int_p)


def _pool_kernel_runtime_p(p_ref, x_ref, o_ref, acc_ref, *, op, n_total, tn,
                           needs_mask, fold, eps):
    _kernel_body(x_ref, o_ref, acc_ref, p_ref[0], op=op, n_total=n_total,
                 tn=tn, needs_mask=needs_mask, fold=fold, eps=eps,
                 static_int_p=None)


# ---------------------------------------------------------------------------
# Wrapper (mirrors PoolingWrapper.__init__ dispatch + forward)
# ---------------------------------------------------------------------------

def pooling_wrapper_forward(x, pool_method, *, p=3.0, eps=1e-6, tile_n=None):
    """Equivalent of PoolingWrapper(pool_method, C, C)(x) on dense (B, N, C)."""
    if pool_method not in ("MAC", "SPoC", "GeM", "GeM_tensor"):
        # TODO(synk): netvlad / netvladgc / transvlad3d not implemented.
        raise NotImplementedError(
            "Unknown pooling method: {}".format(pool_method))

    B, N, C = x.shape
    op = {"MAC": "max", "SPoC": "sum",
          "GeM": "gem", "GeM_tensor": "gem"}[pool_method]

    # Lane packing: (B, N, C) -> (B, N/k, k*C) so every vreg is lane-full.
    pack = 1
    if C < 128 and 128 % C == 0:
        k = 128 // C
        if k > 1 and N % k == 0:
            pack = k
    xw = x.reshape(B, N // pack, pack * C) if pack > 1 else x
    Np, Cp = xw.shape[1], xw.shape[2]

    bt, tn = _choose_tiles(B, Np, Cp, x.dtype.itemsize, tile_n=tile_n)
    grid = (B // bt, pl.cdiv(Np, tn))
    needs_mask = (Np % tn) != 0
    fold = (tn % 8 == 0) and (tn >= 8)
    acc_rows = 8 if fold else 1

    x_spec = pl.BlockSpec((bt, tn, Cp), lambda b, n: (b, n, 0))
    o_spec = pl.BlockSpec((bt, 1, Cp), lambda b, n: (b, 0, 0))
    out_shape = jax.ShapeDtypeStruct((B, 1, Cp), jnp.float32)
    scratch = [pltpu.VMEM((bt, acc_rows, Cp), jnp.float32)]

    in_blk = _padded_block_bytes(bt, tn, Cp, x.dtype.itemsize)
    out_blk = _padded_block_bytes(bt, 1, Cp, 4)
    acc_blk = _padded_block_bytes(bt, acc_rows, Cp, 4)
    vmem_limit = max(32 << 20,
                     min(48 << 20, 2 * in_blk + 2 * out_blk + acc_blk + (8 << 20)))
    cparams = pltpu.CompilerParams(
        dimension_semantics=("parallel", "arbitrary"),
        vmem_limit_bytes=int(vmem_limit),
    )

    static_int_p = None
    if (op == "gem" and isinstance(p, (int, float))
            and float(p) == int(p) and int(p) != 0):
        static_int_p = int(p)

    if op == "gem" and static_int_p is None:
        # Learned / traced exponent: pass p via SMEM.
        p_param = jnp.ravel(jnp.asarray(p, dtype=jnp.float32))[:1]
        kern = functools.partial(_pool_kernel_runtime_p, op=op, n_total=Np,
                                 tn=tn, needs_mask=needs_mask, fold=fold,
                                 eps=eps)
        raw = pl.pallas_call(
            kern, grid=grid,
            in_specs=[pl.BlockSpec(memory_space=pltpu.MemorySpace.SMEM),
                      x_spec],
            out_specs=o_spec, out_shape=out_shape, scratch_shapes=scratch,
            compiler_params=cparams)(p_param, xw)
    else:
        kern = functools.partial(_pool_kernel, op=op, n_total=Np, tn=tn,
                                 needs_mask=needs_mask, fold=fold, eps=eps,
                                 static_int_p=static_int_p)
        raw = pl.pallas_call(
            kern, grid=grid, in_specs=[x_spec], out_specs=o_spec,
            out_shape=out_shape, scratch_shapes=scratch,
            compiler_params=cparams)(xw)

    # Tiny JAX epilogue: combine lane-groups + finalize on (B, pack, C) f32.
    r = raw.reshape(B, pack, C)
    if op == "max":
        y = jnp.max(r, axis=1)
    elif op == "sum":
        y = jnp.sum(r, axis=1) * jnp.float32(1.0 / N)
    else:  # gem
        m = jnp.sum(r, axis=1) * jnp.float32(1.0 / N)
        if static_int_p is not None:
            inv_p = 1.0 / static_int_p
        else:
            inv_p = 1.0 / jnp.asarray(p, jnp.float32)
        y = jnp.power(m, inv_p)
    return y.astype(x.dtype)


# ---------------------------------------------------------------------------
# Pure-JAX references for validation
# ---------------------------------------------------------------------------

def _ref(x, pool_method, p=3.0, eps=1e-6):
    xf = x.astype(jnp.float32)
    if pool_method == "MAC":
        return jnp.max(xf, axis=1).astype(x.dtype)
    if pool_method == "SPoC":
        return jnp.mean(xf, axis=1).astype(x.dtype)
    if pool_method in ("GeM", "GeM_tensor"):
        m = jnp.mean(jnp.power(jnp.maximum(xf, eps), p), axis=1)
        return jnp.power(m, 1.0 / p).astype(x.dtype)
    raise NotImplementedError


if __name__ == "__main__":
    k1, k2, k3, k4 = jax.random.split(jax.random.PRNGKey(0), 4)
    ok = True
    cases = [("MAC", {}), ("SPoC", {}), ("GeM", {}), ("GeM_tensor", {"p": 2.5})]

    def check(x, method, kw, tile_n=None, atol=1e-4):
        y = pooling_wrapper_forward(x, method, tile_n=tile_n, **kw)
        jax.block_until_ready(y)
        y_ref = _ref(x, method, **kw)
        good = (y.shape == (x.shape[0], x.shape[2]) and
                jnp.allclose(y.astype(jnp.float32), y_ref.astype(jnp.float32),
                             atol=atol, rtol=atol))
        return bool(good)

    # 1) Canonical small shape (batch=2, 16 points, in_dim=32): lane-packed
    #    (C=32 -> k=4 -> 128-lane blocks), single tile per sample.
    x1 = jax.random.normal(k1, (2, 16, 32), dtype=jnp.float32)
    for method, kw in cases:
        ok &= check(x1, method, kw)

    # 2) Ragged / multi-tile path: N=19 (no packing), TN=8 -> exercises the
    #    N-tiled accumulator, sublane folding, and last-tile-only masking.
    x2 = jax.random.normal(k2, (2, 19, 32), dtype=jnp.float32)
    for method, kw in cases:
        ok &= check(x2, method, kw, tile_n=8)

    # 3) Full-lane C=128, multi-tile, no masking.
    x3 = jax.random.normal(k3, (2, 64, 128), dtype=jnp.float32)
    for method, kw in [("MAC", {}), ("GeM", {})]:
        ok &= check(x3, method, kw, tile_n=16)

    # 4) bf16 inputs (f32 accumulation inside the kernel).
    x4 = jax.random.normal(k4, (2, 16, 32), dtype=jnp.bfloat16)
    for method, kw in [("MAC", {}), ("SPoC", {})]:
        ok &= check(x4, method, kw, atol=2e-2)

    print("KERNEL_OK" if ok else "KERNEL_MISMATCH")
</pallas_src>

<mosaic_0001>
module attributes {stable_mosaic.version = 11 : i64} {
  func.func @_pool_kernel(%arg0: i32, %arg1: i32, %arg2: memref<1x4x128xf32, #tpu.memory_space<vmem>>, %arg3: memref<1x1x128xf32, #tpu.memory_space<vmem>>, %arg4: memref<1x1x128xf32, #tpu.memory_space<vmem>>) attributes {dimension_semantics = [#tpu.dimension_semantics<parallel>, #tpu.dimension_semantics<arbitrary>], iteration_bounds = array<i64: 2, 1>, scalar_prefetch = 0 : i64, scratch_operands = 1 : i64, tpu.core_type = #tpu.core_type<tc>, window_params = [{transform_indices = @transform_0, window_bounds = array<i64: 1, 4, 128>}, {transform_indices = @transform_1, window_bounds = array<i64: 1, 1, 128>}]} {
    %c0_i32 = arith.constant 0 : i32
    %0 = arith.cmpi eq, %arg1, %c0_i32 : i32
    %1 = arith.extui %0 : i1 to i32
    %c0_i32_0 = arith.constant 0 : i32
    %2 = arith.cmpi ne, %1, %c0_i32_0 : i32
    scf.if %2 {
      %cst_11 = arith.constant 0xFF800000 : f32
      %12 = vector.broadcast %cst_11 : f32 to vector<1x1x128xf32>
      %c0_12 = arith.constant 0 : index
      %c0_13 = arith.constant 0 : index
      %c0_14 = arith.constant 0 : index
      %13 = vector.load %arg4[%c0_12, %c0_13, %c0_14] : memref<1x1x128xf32, #tpu.memory_space<vmem>>, vector<1x1x128xf32>
      tpu.vector_store %arg4[%c0_12, %c0_13, %c0_14], %12 {strides = array<i32>} : memref<1x1x128xf32, #tpu.memory_space<vmem>>, vector<1x1x128xf32>,
    } else {
    }
    %c0 = arith.constant 0 : index
    %c0_1 = arith.constant 0 : index
    %c0_2 = arith.constant 0 : index
    %3 = vector.load %arg2[%c0, %c0_1, %c0_2] : memref<1x4x128xf32, #tpu.memory_space<vmem>>, vector<1x4x128xf32>
    %cst = arith.constant dense<0xFF800000> : vector<1x128xf32>
    %4 = vector.multi_reduction <maximumf>, %3, %cst [1] : vector<1x4x128xf32> to vector<1x128xf32>
    %5 = vector.shape_cast %4 : vector<1x128xf32> to vector<1x1x128xf32>
    %c0_3 = arith.constant 0 : index
    %c0_4 = arith.constant 0 : index
    %c0_5 = arith.constant 0 : index
    %6 = vector.load %arg4[%c0_3, %c0_4, %c0_5] : memref<1x1x128xf32, #tpu.memory_space<vmem>>, vector<1x1x128xf32>
    %7 = arith.maximumf %6, %5 : vector<1x1x128xf32>
    %c0_6 = arith.constant 0 : index
    %c0_7 = arith.constant 0 : index
    %c0_8 = arith.constant 0 : index
    %8 = vector.load %arg4[%c0_6, %c0_7, %c0_8] : memref<1x1x128xf32, #tpu.memory_space<vmem>>, vector<1x1x128xf32>
    tpu.vector_store %arg4[%c0_6, %c0_7, %c0_8], %7 {strides = array<i32>} : memref<1x1x128xf32, #tpu.memory_space<vmem>>, vector<1x1x128xf32>,
    %c0_i32_9 = arith.constant 0 : i32
    %9 = arith.cmpi eq, %arg1, %c0_i32_9 : i32
    %10 = arith.extui %9 : i1 to i32
    %c0_i32_10 = arith.constant 0 : i32
    %11 = arith.cmpi ne, %10, %c0_i32_10 : i32
    scf.if %11 {
      %c0_11 = arith.constant 0 : index
      %c0_12 = arith.constant 0 : index
      %c0_13 = arith.constant 0 : index
      %12 = vector.load %arg4[%c0_11, %c0_12, %c0_13] : memref<1x1x128xf32, #tpu.memory_space<vmem>>, vector<1x1x128xf32>
      %cst_14 = arith.constant dense<0xFF800000> : vector<1x128xf32>
      %13 = vector.multi_reduction <maximumf>, %12, %cst_14 [1] : vector<1x1x128xf32> to vector<1x128xf32>
      %14 = vector.shape_cast %13 : vector<1x128xf32> to vector<1x1x128xf32>
      %c0_15 = arith.constant 0 : index
      %c0_16 = arith.constant 0 : index
      %c0_17 = arith.constant 0 : index
      %15 = vector.load %arg3[%c0_15, %c0_16, %c0_17] : memref<1x1x128xf32, #tpu.memory_space<vmem>>, vector<1x1x128xf32>
      tpu.vector_store %arg3[%c0_15, %c0_16, %c0_17], %14 {strides = array<i32>} : memref<1x1x128xf32, #tpu.memory_space<vmem>>, vector<1x1x128xf32>,
    } else {
    }
    return
  }
  func.func @transform_0(%arg0: i32, %arg1: i32) -> (i32, i32, i32) {
    %c0_i32 = arith.constant 0 : i32
    %c0_i32_0 = arith.constant 0 : i32
    return %arg0, %arg1, %c0_i32 : i32, i32, i32
  }
  func.func @transform_1(%arg0: i32, %arg1: i32) -> (i32, i32, i32) {
    %c0_i32 = arith.constant 0 : i32
    %c0_i32_0 = arith.constant 0 : i32
    %c0_i32_1 = arith.constant 0 : i32
    return %arg0, %c0_i32, %c0_i32_0 : i32, i32, i32
  }
}

</mosaic_0001>

<bundles_post_ra>
// kernel: tpu_custom_call.1
= control target key start
LH: loop header
LB: loop body
LE: loop exit
PB: predicated region body
PF: predicated region fallthrough
CT: control target
= control target key end

     0   :  { %6 = vsyncpa [#allocation4], 0  ;;  %s594_s0 = inlined_call_operand.hbm [shape: f32[2,4,128], index: 0, kind: input, shape index: {}]   ;;  %s595_s1 = inlined_call_operand.hbm [shape: f32[2,1,128], index: 1, kind: output, shape index: {}]  }
   0x1   :  { %8 = vsyncpa [#allocation4 + $0x1], 0 }
   0x2   :  { %9 = vsyncpa [#allocation5], 0 }
   0x3   :  { %11 = vsyncpa [#allocation5 + $0x1], 0  ;;  %s453_s6 = smov 0   ;;  %s455_s7 = smov 0  }
   0x4   :  { %s457_s8 = smov 0   ;;  %s459_s9 = smov 0  }
   0x5   :  { %s461_s10 = smov 0   ;;  %s463_s11 = smov 0  }
   0x6 LB: > { %s256_s12 = sadd.s32 4294967295, %s438_s11   ;;  %s257_s13 = sadd.s32 4294967294, %s438_s11   ;;  %s438_s11 = sphi %s463_s11, %s17_s11   ;;  %s434_s10 = sphi %s461_s10, %s607_s10   ;;  %s430_s9 = sphi %s459_s9, %s606_s9   ;;  %s426_s8 = sphi %s457_s8, %s605_s8   ;;  %s422_s7 = sphi %s455_s7, %s604_s7   ;;  %s418_s6 = sphi %s453_s6, %s603_s6  }
   0x7   : > { %s29_s14 = sadd.s32 1, %s434_s10  ;;  %s38_s15 = sadd.s32 1, %s426_s8 }
   0x8   : > { %p31_p0 = scmp.ge.s32.totalorder %s29_s14, 2  ;;  %p45_p1 = scmp.ne.s32.totalorder %s426_s8, %s422_s7 }
   0x9   : > { %p46_p2 = scmp.eq.s32.totalorder %s438_s11, 0  ;;  %p51_p3 = scmp.ne.s32.totalorder %s422_s7, %s418_s6 }
   0xa   : > { %s609_s14 = smov (%p31_p0, %s29_s14), 0  ;;  %p52_p5 = scmp.eq.s32.totalorder %s256_s12, 0 }
   0xb   : > { %p494_p4 = por %p46_p2, %p45_p1  ;;  %s33_s17 = ssub.s32 %s434_s10, %s609_s14 }
   0xc   : > { %p75_p6 = scmp.eq.s32.totalorder %s256_s12, 1  ;;  %p36_p7 = scmp.eq.s32.totalorder %s33_s17, 0 }
   0xd   : > { %p500_p8 = por %p52_p5, %p51_p3  ;;  %p81_p10 = scmp.eq.s32.totalorder %s257_s13, 1 }
   0xe   : > { %p504_p9 = por %p75_p6, %p45_p1  ;;  %p279_p13 = scmp.lt.s32.totalorder %s438_s11, 2 }
   0xf   : > { %s509_s20 = scalar_select %p36_p7, %s426_s8, %s38_s15  }
  0x10   : > { %p511_p11 = por %p81_p10, %p51_p3  ;;  %s101_s22 = sand.u32 1, %s426_s8  }
  0x11   : > { %s260_s23 = sshll.u32 %s101_s22, 2  ;;  %s261_s24 = sshll.u32 %s434_s10, 6 }
  0x12   : > { %s599_s21 = scalar_select %p511_p11, 1, 0 }
  0x13   : > { %s111_s27 = scalar_lea.hbm %s594_s0, %s261_s24  ;;  %s105_s28 = scalar_lea.vmem [#allocation3], %s260_s23 }
  0x14   : > { %s113_s29 = sshll.u32 %s105_s28, 4  ;;  %p524_p0 = pnand %p279_p13, %p494_p4  ;;  %s114_s29 = int_to_ptr.vmem [resolvable:$true] %s113_s29 }
  0x15   : > { %p262_p1 = scmp.ge.s32.totalorder %s438_s11, 1  ;;  %p118_p2 = scmp.lt.s32.totalorder %s438_s11, 3 }
  0x16   : > { %s102_s2 = scalar_lea.sflag [#allocation4], %s101_s22  ;;  %p332_p3 = pneg %p524_p0 }
  0x17   : > { %s343_s3 = scalar_lea.vmem %s114_s29, 64  ;;  %s440_s4 = smov [#allocation3]  }
  0x18   : > { %p344_p5 = scmp.ne.s32.totalorder %s114_s29, %s343_s3  ;;  %s348_s5 = sshll.u32 %s440_s4, 4  ;;  %s349_s5 = int_to_ptr.vmem [resolvable:$false] %s348_s5 }
  0x19   : > { %s350_s12 = scalar_lea.vmem %s349_s5, 128  ;;  %p351_p10 = scmp.lt.s32.totalorder %s114_s29, %s349_s5 }
  0x1a   : > { %p346_p6 = pnand %p344_p5, %p332_p3  ;;  %p352_p12 = scmp.lt.s32.totalorder %s350_s12, %s343_s3 }
  0x1c   : > { %p347_p7 = pneg %p346_p6  ;;  %p353_p4 = por %p352_p12, %p351_p10 }
  0x1e   : > { %p354_p13 = pnand %p353_p4, %p347_p7 }
  0x20   : > { %357 = shalt.err (!%p354_p13)
}
  0x21   : > { %274 = dma.hbm_to_vmem [thread:$0]  (!%p524_p0), %s111_s27, 64, %s114_s29, %s102_s2  }
  0x22   : > { %p119_p11 = pnand %p262_p1, %p118_p2 }
  0x23   : > { %s539_s13 = sand.u32 (!%p119_p11), 1, %s422_s7  }
  0x24   : > { %122 = sbr.rel (%p119_p11) target bundleno = 79 (0x4f), region = 24  ;;  %s263_s15 = sshll.u32 (!%p119_p11), %s539_s13, 2 }
  0x25   : > { %s125_s16 = scalar_lea.sflag (!%p119_p11), [#allocation4], %s539_s13  ;;  %s128_s17 = scalar_lea.vmem (!%p119_p11), [#allocation3], %s263_s15 }
  0x29   : > { %409 = dma.done.wait (%p500_p8), %s125_s16, 64  }
  0x2a   : > { %411 = vsyncadd (%p500_p8), %s125_s16, 4294967232  ;;  %v441_v0 = vmov -inf   ;;  %vm152_vm0 = vcmask 1043456   ;;  %v151_v1 = vld [vmem:[%s128_s17] sm:$0xf]  ;;  %s145_s18 = scalar_lea.vmem [#allocation6], %s539_s13 }
  0x2b   : > { %150 = vst [vmem:[#allocation2] sm:$0x1] %v441_v0  ;;  %v153_v2 = vsel %vm152_vm0, %v151_v1, -inf  ;;  %s181_s22 = sshll.u32 %s145_s18, 4  ;;  %s264_s23 = sshll.u32 %s430_s9, 4  ;;  %s549_s22 = int_to_ptr.vmem [resolvable:$true] %s181_s22 }
  0x2c   : > { %v154_v3 = vrot.slane %v153_v2, 4  ;;  %s179_s26 = scalar_lea.hbm %s595_s1, %s264_s23  ;;  %s169_s27 = scalar_lea.sflag [#allocation5], %s539_s13 }
  0x2d   : > { %s358_s28 = scalar_lea.vmem %s549_s22, 16  ;;  %s442_s29 = smov [#allocation6]  }
  0x2e   : > { %v155_v4 = vmax.f32 %v153_v2, %v154_v3  ;;  %p359_p8 = scmp.ne.s32.totalorder %s549_s22, %s358_s28  ;;  %s362_s30 = sshll.u32 %s442_s29, 4  ;;  %s363_s30 = int_to_ptr.vmem [resolvable:$false] %s362_s30 }
  0x2f   : > { %s364_s9 = scalar_lea.vmem %s363_s30, 32  ;;  %p365_p0 = scmp.lt.s32.totalorder %s549_s22, %s363_s30 }
  0x30   : > { %v156_v5 = vrot.slane %v155_v4, 2  ;;  %p360_p11 = pnand %p359_p8, %p504_p9  ;;  %p366_p1 = scmp.lt.s32.totalorder %s364_s9, %s358_s28 }
  0x32   : > { %v157_v6 = vmax.f32 %v155_v4, %v156_v5  ;;  %v160_v8 = vld [vmem:[#allocation2] sm:$0x1]  ;;  %p361_p12 = pneg %p360_p11  ;;  %p367_p2 = por %p366_p1, %p365_p0 }
  0x34   : > { %v158_v7 = vrot.slane %v157_v6, 1  ;;  %p368_p3 = pnand %p367_p2, %p361_p12 }
  0x36   : > { %v159_v9 = vmax.f32 %v157_v6, %v158_v7 }
  0x38   : > { %v161_v10 = vmax.f32 %v160_v8, %v159_v9 }
  0x3a   : > { %162 = vst [vmem:[#allocation2] sm:$0x1] %v161_v10 }
  0x41   : > { %v166_v11 = vld [vmem:[#allocation2] sm:$0x1] }
  0x42   : > { %167 = vst [vmem:[%s145_s18] sm:$0x1] %v166_v11 }
  0x43   : > { %371 = shalt.err (!%p368_p3)
}
  0x44   : > { %s372_s2 = scalar_lea.hbm %s179_s26, 16  ;;  %s376_s5 = scalar_lea.hbm %s595_s1, 32 }
  0x45   : > { %p373_p5 = scmp.ne.s32.totalorder %s179_s26, %s372_s2  ;;  %p377_p10 = scmp.lt.s32.totalorder %s179_s26, %s595_s1 }
  0x46   : > { %p378_p4 = scmp.lt.s32.totalorder %s376_s5, %s372_s2 }
  0x47   : > { %p374_p6 = pnand %p373_p5, %p504_p9 }
  0x48   : > { %p379_p13 = por %p378_p4, %p377_p10 }
  0x49   : > { %p375_p7 = pneg %p374_p6 }
  0x4b   : > { %p380_p8 = pnand %p379_p13, %p375_p7 }
  0x4d   : > { %383 = shalt.err (!%p380_p8)
}
  0x4e   : > { %269 = dma.vmem_to_hbm [thread:$0]  (%p504_p9), %s549_s22, 16, %s179_s26, %s169_s27  }
  0x4f PF: > { %s193_s15 = sand.u32 1, %s418_s6   ;;  %p601_p11 = scmp.ne.s32.totalorder %s599_s21, 0 }
  0x50   : > { %p602_p12 = scmp.ge.s32.totalorder %s438_s11, 2  ;;  %s194_s16 = scalar_lea.sflag [#allocation5], %s193_s15 }
  0x52   : > { %p276_p0 = pnand %p602_p12, %p601_p11 }
  0x54   : > { %p277_p1 = pneg %p276_p0 }
  0x56   : > { %413 = dma.done.wait (%p277_p1), %s194_s16, 16  }
  0x57   : > { %415 = vsyncadd (%p277_p1), %s194_s16, 4294967280  ;;  %s17_s11 = sadd.s32 1, %s438_s11   ;;  %s603_s6 = smov %s422_s7 }
  0x58   : > { %p14_p2 = scmp.ge.s32.totalorder %s17_s11, 4   ;;  %s604_s7 = smov %s426_s8 }
  0x59   : > { %s605_s8 = smov %s509_s20  ;;  %s606_s9 = smov %s434_s10 }
  0x5a   : > { %s607_s10 = smov %s609_s14  ;;  %16 = sbr.rel (!%p14_p2) target bundleno = 6 (0x6), region = 77 }
  0x5f   :  { %198 = vsyncpa [#allocation4], 1 }
  0x60   :  { %200 = vsyncpa [#allocation4 + $0x1], 1 }
  0x61   :  { %201 = vsyncpa [#allocation5], 1 }
  0x62   :  { %203 = vsyncpa [#allocation5 + $0x1], 1 }

</bundles_post_ra>
